<compile_context>
chip_gen: v7x
topology: tpu7x:2x2x1
jax: 0.10.0
libtpu: 0.0.40
codegen_flags: <defaults>
</compile_context>

<pallas_src>
import jax
import jax.numpy as jnp
from jax.experimental import pallas as pl
from jax.experimental.pallas import tpu as pltpu

_LANE = 128
_WIDTH_CANDIDATES = (4096, 2048, 1024, 512, 256, 128)  # lane-dense last dims
_BLOCK_BYTES = 4 << 20          # ~4 MiB per operand buffer per grid step
_VMEM_LIMIT = 32 << 20          # 3 operands x 2 buffers x 4 MiB + headroom
_MIN_PALLAS_ELEMS = 16384       # below this, a Pallas launch is pure overhead


def _fusion_moe_kernel(g_ref, gnn_ref, vis_ref, out_ref):
    # g_ref: (1, 1) f32 gate in SMEM; gnn/vis/out: (block_rows, W) tiles in VMEM.
    g = g_ref[0, 0]
    gnn = gnn_ref[...].astype(jnp.float32)   # in-kernel upcast (VPU has slack)
    vis = vis_ref[...].astype(jnp.float32)
    out_ref[...] = (g * gnn + (1.0 - g) * vis).astype(out_ref.dtype)


def _pick_width(n):
    for w in _WIDTH_CANDIDATES:
        if n % w == 0:
            return w
    return None


def fusion_moe_forward(g, gnn_score, vision_score):
    """final_score = g * gnn_score + (1 - g) * vision_score (torch semantics)."""
    g_arr = jnp.asarray(g, jnp.float32)
    g_scalar = g_arr.reshape(-1)[0]
    # Torch promotion: the f32 gate participates (bf16 scores -> f32 output).
    out_dtype = jnp.result_type(gnn_score.dtype, vision_score.dtype, g_arr.dtype)

    n = int(jnp.broadcast_shapes(gnn_score.shape, vision_score.shape) and
            max(gnn_score.size, vision_score.size))
    orig_shape = gnn_score.shape

    # Fallback path: differing shapes (torch broadcasting) or tiny inputs.
    # XLA fuses the scalar-gated blend into a single pass; a Pallas launch plus
    # pad/slice glue would only add latency here.
    if (gnn_score.shape != vision_score.shape) or (n < _MIN_PALLAS_ELEMS):
        return (g_scalar * gnn_score + (1.0 - g_scalar) * vision_score).astype(out_dtype)

    # ---- Pallas path: equal shapes, large enough to be bandwidth-bound ------
    gnn_flat = gnn_score.reshape(-1)          # native dtype, free reshape
    vis_flat = vision_score.reshape(-1)

    width = _pick_width(n)
    ragged = width is None
    if ragged:
        # Pad only the tail to the next multiple of 512 (small pad, one pass).
        total = -(-n // 512) * 512
        pad = total - n
        gnn_flat = jnp.pad(gnn_flat, (0, pad))
        vis_flat = jnp.pad(vis_flat, (0, pad))
        width = _pick_width(total)
    else:
        total = n

    rows = total // width

    # Block rows sized to ~_BLOCK_BYTES per operand buffer, multiple of 8.
    itemsize = max(gnn_score.dtype.itemsize, vision_score.dtype.itemsize,
                   jnp.dtype(out_dtype).itemsize)
    block_rows = max(8, ((_BLOCK_BYTES // itemsize) // width) // 8 * 8)
    if rows <= block_rows:
        block_rows = rows                      # single full-extent block
    grid = (pl.cdiv(rows, block_rows),)        # partial last block is masked

    blk = pl.BlockSpec((block_rows, width), lambda i: (i, 0))
    g_smem = g_arr.reshape(1, 1)

    bytes_accessed = n * (gnn_score.dtype.itemsize + vision_score.dtype.itemsize
                          + jnp.dtype(out_dtype).itemsize)

    out2d = pl.pallas_call(
        _fusion_moe_kernel,
        out_shape=jax.ShapeDtypeStruct((rows, width), out_dtype),
        grid=grid,
        in_specs=[
            pl.BlockSpec(memory_space=pltpu.MemorySpace.SMEM),  # gate scalar
            blk,                                                # gnn_score tile
            blk,                                                # vision_score tile
        ],
        out_specs=blk,
        compiler_params=pltpu.CompilerParams(
            dimension_semantics=("parallel",),
            vmem_limit_bytes=_VMEM_LIMIT,
        ),
        cost_estimate=pl.CostEstimate(
            flops=3 * n, transcendentals=0, bytes_accessed=bytes_accessed),
    )(g_smem, gnn_flat.reshape(rows, width), vis_flat.reshape(rows, width))

    if ragged:
        return out2d.reshape(-1)[:n].reshape(orig_shape)
    return out2d.reshape(orig_shape)           # free bitcast, no copy


if __name__ == "__main__":
    key = jax.random.PRNGKey(0)
    k1, k2, k3, k4, k5, k6 = jax.random.split(key, 6)

    # Module init: self.g = nn.Parameter(torch.ones(1))
    g_init = jnp.ones((1,), jnp.float32)

    # 1) Lane-aligned scores -> Pallas fast path (no pad, no slice).
    shape = (256, 512)
    gnn = jax.random.normal(k1, shape, jnp.float32)
    vis = jax.random.normal(k2, shape, jnp.float32)
    out = jax.block_until_ready(fusion_moe_forward(g_init, gnn, vis))
    ref = g_init[0] * gnn + (1.0 - g_init[0]) * vis
    assert out.shape == shape
    assert bool(jnp.allclose(out, ref, atol=1e-6, rtol=1e-6))

    # 2) Ragged size, mixed dtype, non-trivial gate -> padded Pallas path with
    #    in-kernel upcast; output promotes to float32 like torch.
    g_trained = jnp.array([0.3], jnp.float32)
    shape2 = (3000, 7)
    gnn2 = jax.random.normal(k3, shape2, jnp.float32).astype(jnp.bfloat16)
    vis2 = jax.random.normal(k4, shape2, jnp.float32)
    out2 = jax.block_until_ready(fusion_moe_forward(g_trained, gnn2, vis2))
    ref2 = g_trained[0] * gnn2.astype(jnp.float32) + (1.0 - g_trained[0]) * vis2
    assert out2.shape == shape2 and out2.dtype == jnp.float32
    assert bool(jnp.allclose(out2, ref2, atol=1e-5, rtol=1e-5))

    # 3) Tiny score column (like the module's typical (N, 1) use) -> fused jnp
    #    fallback; a kernel launch would be pure latency at this size.
    shape3 = (2000, 1)
    gnn3 = jax.random.normal(k5, shape3, jnp.float32)
    vis3 = jax.random.normal(k6, shape3, jnp.float32)
    out3 = jax.block_until_ready(fusion_moe_forward(g_trained, gnn3, vis3))
    ref3 = g_trained[0] * gnn3 + (1.0 - g_trained[0]) * vis3
    assert out3.shape == shape3
    assert bool(jnp.allclose(out3, ref3, atol=1e-6, rtol=1e-6))

    print("KERNEL_OK")
</pallas_src>

<mosaic_0001>
module attributes {stable_mosaic.version = 11 : i64} {
  func.func @_fusion_moe_kernel(%arg0: i32, %arg1: memref<1x1xf32, #tpu.memory_space<smem>>, %arg2: memref<32x4096xf32, #tpu.memory_space<vmem>>, %arg3: memref<32x4096xf32, #tpu.memory_space<vmem>>, %arg4: memref<32x4096xf32, #tpu.memory_space<vmem>>) attributes {dimension_semantics = [#tpu.dimension_semantics<parallel>], iteration_bounds = array<i64: 1>, scalar_prefetch = 0 : i64, scratch_operands = 0 : i64, tpu.core_type = #tpu.core_type<tc>, window_params = [{transform_indices = @transform_0, window_bounds = array<i64: 1, 1>}, {transform_indices = @transform_1, window_bounds = array<i64: 32, 4096>}, {transform_indices = @transform_2, window_bounds = array<i64: 32, 4096>}, {transform_indices = @transform_3, window_bounds = array<i64: 32, 4096>}]} {
    %c0 = arith.constant 0 : index
    %c0_0 = arith.constant 0 : index
    %0 = memref.load %arg1[%c0, %c0_0] : memref<1x1xf32, #tpu.memory_space<smem>>
    %c0_1 = arith.constant 0 : index
    %c0_2 = arith.constant 0 : index
    %1 = vector.load %arg2[%c0_1, %c0_2] : memref<32x4096xf32, #tpu.memory_space<vmem>>, vector<32x4096xf32>
    %c0_3 = arith.constant 0 : index
    %c0_4 = arith.constant 0 : index
    %2 = vector.load %arg3[%c0_3, %c0_4] : memref<32x4096xf32, #tpu.memory_space<vmem>>, vector<32x4096xf32>
    %3 = vector.broadcast %0 : f32 to vector<32x4096xf32>
    %4 = arith.mulf %3, %1 : vector<32x4096xf32>
    %cst = arith.constant 1.000000e+00 : f32
    %5 = arith.subf %cst, %0 : f32
    %6 = vector.broadcast %5 : f32 to vector<32x4096xf32>
    %7 = arith.mulf %6, %2 : vector<32x4096xf32>
    %8 = arith.addf %4, %7 : vector<32x4096xf32>
    %c0_5 = arith.constant 0 : index
    %c0_6 = arith.constant 0 : index
    %9 = vector.load %arg4[%c0_5, %c0_6] : memref<32x4096xf32, #tpu.memory_space<vmem>>, vector<32x4096xf32>
    tpu.vector_store %arg4[%c0_5, %c0_6], %8 {strides = array<i32>} : memref<32x4096xf32, #tpu.memory_space<vmem>>, vector<32x4096xf32>,
    return
  }
  func.func @transform_0(%arg0: i32) -> (i32, i32) {
    %c0_i32 = arith.constant 0 : i32
    %c0_i32_0 = arith.constant 0 : i32
    %c0_i32_1 = arith.constant 0 : i32
    return %c0_i32, %c0_i32_0 : i32, i32
  }
  func.func @transform_1(%arg0: i32) -> (i32, i32) {
    %c0_i32 = arith.constant 0 : i32
    %c0_i32_0 = arith.constant 0 : i32
    return %arg0, %c0_i32 : i32, i32
  }
  func.func @transform_2(%arg0: i32) -> (i32, i32) {
    %c0_i32 = arith.constant 0 : i32
    %c0_i32_0 = arith.constant 0 : i32
    return %arg0, %c0_i32 : i32, i32
  }
  func.func @transform_3(%arg0: i32) -> (i32, i32) {
    %c0_i32 = arith.constant 0 : i32
    %c0_i32_0 = arith.constant 0 : i32
    return %arg0, %c0_i32 : i32, i32
  }
}

</mosaic_0001>

<bundles_post_ra>
// kernel: tpu_custom_call.1
= control target key start
LH: loop header
LB: loop body
LE: loop exit
PB: predicated region body
PF: predicated region fallthrough
CT: control target
= control target key end

     0   :  { %9 = vsyncpa [#allocation4], 0  ;;  %s1247_s0 = inlined_call_operand.<no memory space> [shape: f32[1,1], index: 0, kind: input, shape index: {}]   ;;  %s1248_s1 = inlined_call_operand.hbm [shape: f32[32,4096], index: 1, kind: input, shape index: {}]   ;;  %s1249_s2 = inlined_call_operand.hbm [shape: f32[32,4096], index: 2, kind: input, shape index: {}]   ;;  %s1250_s3 = inlined_call_operand.hbm [shape: f32[32,4096], index: 3, kind: output, shape index: {}]  }
   0x1   :  { %10 = vsyncpa [#allocation7], 0 }
   0x2   :  { %11 = vsyncpa [#allocation5], 0  ;;  %s911_s12 = smov [#allocation3]   ;;  %s839_s16 = scalar_lea.hbm %s1248_s1, 16384 }
   0x3   :  { %s19_s13 = sshll.u32 %s911_s12, 4  ;;  %p840_p0 = scmp.ne.s32.totalorder %s1248_s1, %s839_s16  ;;  %s20_s13 = int_to_ptr.vmem [resolvable:$true] %s19_s13 }
   0x4   :  { %p843_p1 = scmp.lt.u32.totalorder %s839_s16, %s1248_s1 }
   0x6   :  { %p845_p2 = pnand %p843_p1, %p840_p0 }
   0x8   :  { %848 = shalt.err (!%p845_p2)
}
   0x9   :  { %s849_s21 = scalar_lea.vmem %s20_s13, 16384  ;;  %p854_p4 = scmp.lt.s32.totalorder %s20_s13, %s20_s13 }
   0xa   :  { %p850_p3 = scmp.ne.s32.totalorder %s20_s13, %s849_s21  ;;  %p855_p5 = scmp.lt.s32.totalorder %s849_s21, %s849_s21 }
   0xc   :  { %p856_p6 = por %p855_p5, %p854_p4 }
   0xe   :  { %p857_p7 = pnand %p856_p6, %p850_p3 }
  0x10   :  { %860 = shalt.err (!%p857_p7)
}
  0x11   :  { %s912_s22 = smov 4096   ;;  %s913_s23 = smov 256  }
  0x12   :  { %25 = dma.hbm_to_vmem [thread:$0]  %s1248_s1, 16384, %s20_s13, [#allocation4], %s912_s22, %s912_s22, %s913_s23  }
  0x13   :  { %s914_s26 = smov [#allocation6]   ;;  %s861_s30 = scalar_lea.hbm %s1249_s2, 16384 }
  0x14   :  { %s31_s27 = sshll.u32 %s914_s26, 4  ;;  %p862_p8 = scmp.ne.s32.totalorder %s1249_s2, %s861_s30  ;;  %s32_s27 = int_to_ptr.vmem [resolvable:$true] %s31_s27 }
  0x15   :  { %p865_p9 = scmp.lt.u32.totalorder %s861_s30, %s1249_s2 }
  0x17   :  { %p867_p10 = pnand %p865_p9, %p862_p8 }
  0x19   :  { %870 = shalt.err (!%p867_p10)
}
  0x1a   :  { %s871_s8 = scalar_lea.vmem %s32_s27, 16384  ;;  %p876_p12 = scmp.lt.s32.totalorder %s32_s27, %s32_s27 }
  0x1b   :  { %p872_p11 = scmp.ne.s32.totalorder %s32_s27, %s871_s8  ;;  %p877_p13 = scmp.lt.s32.totalorder %s871_s8, %s871_s8 }
  0x1d   :  { %p878_p0 = por %p877_p13, %p876_p12 }
  0x1f   :  { %p879_p1 = pnand %p878_p0, %p872_p11 }
  0x21   :  { %882 = shalt.err (!%p879_p1)
}
  0x22   :  { %37 = dma.hbm_to_vmem [thread:$0]  %s1249_s2, 16384, %s32_s27, [#allocation7], %s912_s22, %s912_s22, %s913_s23  }
  0x23   :  { %905 = dma.done.wait [#allocation4], 16384  }
  0x24   :  { %906 = vsyncadd [#allocation4], 4294950912 }
  0x25   :  { %907 = dma.done.wait [#allocation7], 16384  }
  0x26   :  { %908 = vsyncadd [#allocation7], 4294950912  ;;  %s430_s12 = ssub.f32 1.0, %s1247_s0  ;;  %v972_v0 = vstv %s1247_s0  ;;  %v45_v2 = vld [vmem:[#allocation3] sm:$0xff]  ;;  %v46_v4 = vld [vmem:[#allocation3 + $0x8] sm:$0xff]  ;;  %s915_s0 = smov [#allocation8]  }
  0x27   :  { %v173_v3 = vld [vmem:[#allocation6] sm:$0xff]  ;;  %v302_v5 = vmul.f32 %v972_v0, %v45_v2  ;;  %v174_v7 = vld [vmem:[#allocation6 + $0x8] sm:$0xff]  ;;  %v303_v8 = vmul.f32 %v972_v0, %v46_v4  ;;  %v47_v9 = vld [vmem:[#allocation3 + $0x10] sm:$0xff]  ;;  %s821_s2 = sshll.u32 %s915_s0, 4  ;;  %s822_s2 = int_to_ptr.vmem [resolvable:$true] %s821_s2 }
  0x28   :  { %v974_v1 = vstv %s430_s12  ;;  %v175_v10 = vld [vmem:[#allocation6 + $0x10] sm:$0xff]  ;;  %v304_v12 = vmul.f32 %v972_v0, %v47_v9  ;;  %v48_v14 = vld [vmem:[#allocation3 + $0x18] sm:$0xff]  ;;  %v49_v16 = vld [vmem:[#allocation3 + $0x20] sm:$0xff]  ;;  %s883_s15 = scalar_lea.vmem %s822_s2, 16384  ;;  %p888_p3 = scmp.lt.s32.totalorder %s822_s2, %s822_s2 }
  0x29   :  { %v432_v6 = vmul.f32 %v974_v1, %v173_v3  ;;  %v433_v11 = vmul.f32 %v974_v1, %v174_v7  ;;  %v434_v13 = vmul.f32 %v974_v1, %v175_v10  ;;  %v176_v15 = vld [vmem:[#allocation6 + $0x18] sm:$0xff]  ;;  %v305_v18 = vmul.f32 %v972_v0, %v48_v14  ;;  %v177_v20 = vld [vmem:[#allocation6 + $0x20] sm:$0xff]  ;;  %v50_v22 = vld [vmem:[#allocation3 + $0x28] sm:$0xff]  ;;  %p884_p2 = scmp.ne.s32.totalorder %s822_s2, %s883_s15  ;;  %p889_p4 = scmp.lt.s32.totalorder %s883_s15, %s883_s15 }
  0x2a   :  { %v435_v19 = vmul.f32 %v974_v1, %v176_v15  ;;  %v306_v21 = vmul.f32 %v972_v0, %v49_v16  ;;  %v178_v23 = vld [vmem:[#allocation6 + $0x28] sm:$0xff]  ;;  %v436_v26 = vmul.f32 %v974_v1, %v177_v20  ;;  %v307_v27 = vmul.f32 %v972_v0, %v50_v22  ;;  %v51_v28 = vld [vmem:[#allocation3 + $0x30] sm:$0xff]  ;;  %v52_v30 = vld [vmem:[#allocation3 + $0x38] sm:$0xff] }
  0x2b   :  { %v560_v17 = vadd.f32 %v432_v6, %v302_v5  ;;  %v561_v24 = vadd.f32 %v433_v11, %v303_v8  ;;  %v562_v25 = vadd.f32 %v434_v13, %v304_v12  ;;  %v179_v29 = vld [vmem:[#allocation6 + $0x30] sm:$0xff]  ;;  %v437_v32 = vmul.f32 %v974_v1, %v178_v23  ;;  %v180_v35 = vld [vmem:[#allocation6 + $0x38] sm:$0xff]  ;;  %v53_v36 = vld [vmem:[#allocation3 + $0x40] sm:$0xff]  ;;  %p890_p5 = por %p889_p4, %p888_p3 }
  0x2c   :  { %v563_v31 = vadd.f32 %v435_v19, %v305_v18  ;;  %v308_v33 = vmul.f32 %v972_v0, %v51_v28  ;;  %v438_v34 = vmul.f32 %v974_v1, %v179_v29  ;;  %v181_v37 = vld [vmem:[#allocation6 + $0x40] sm:$0xff]  ;;  %v564_v38 = vadd.f32 %v436_v26, %v306_v21  ;;  %v54_v42 = vld [vmem:[#allocation3 + $0x48] sm:$0xff]  ;;  %v55_v44 = vld [vmem:[#allocation3 + $0x50] sm:$0xff] }
  0x2d   :  { %688 = vst [vmem:[#allocation8] sm:$0xff] %v560_v17  ;;  %689 = vst [vmem:[#allocation8 + $0x8] sm:$0xff] %v561_v24  ;;  %v309_v39 = vmul.f32 %v972_v0, %v52_v30  ;;  %v439_v40 = vmul.f32 %v974_v1, %v180_v35  ;;  %v310_v41 = vmul.f32 %v972_v0, %v53_v36  ;;  %v182_v43 = vld [vmem:[#allocation6 + $0x48] sm:$0xff]  ;;  %v183_v49 = vld [vmem:[#allocation6 + $0x50] sm:$0xff]  ;;  %p891_p6 = pnand %p890_p5, %p884_p2 }
  0x2e   :  { %690 = vst [vmem:[#allocation8 + $0x10] sm:$0xff] %v562_v25  ;;  %691 = vst [vmem:[#allocation8 + $0x18] sm:$0xff] %v563_v31  ;;  %v565_v45 = vadd.f32 %v437_v32, %v307_v27  ;;  %v566_v46 = vadd.f32 %v438_v34, %v308_v33  ;;  %v440_v47 = vmul.f32 %v974_v1, %v181_v37  ;;  %v56_v50 = vld [vmem:[#allocation3 + $0x58] sm:$0xff]  ;;  %v57_v56 = vld [vmem:[#allocation3 + $0x60] sm:$0xff] }
  0x2f   :  { %v311_v48 = vmul.f32 %v972_v0, %v54_v42  ;;  %v184_v51 = vld [vmem:[#allocation6 + $0x58] sm:$0xff]  ;;  %692 = vst [vmem:[#allocation8 + $0x20] sm:$0xff] %v564_v38  ;;  %v567_v52 = vadd.f32 %v439_v40, %v309_v39  ;;  %v441_v53 = vmul.f32 %v974_v1, %v182_v43  ;;  %v312_v54 = vmul.f32 %v972_v0, %v55_v44  ;;  %v185_v57 = vld [vmem:[#allocation6 + $0x60] sm:$0xff]  ;;  %v58_v58 = vld [vmem:[#allocation3 + $0x68] sm:$0xff] }
  0x30   :  { %v442_v55 = vmul.f32 %v974_v1, %v183_v49  ;;  %693 = vst [vmem:[#allocation8 + $0x28] sm:$0xff] %v565_v45  ;;  %694 = vst [vmem:[#allocation8 + $0x30] sm:$0xff] %v566_v46  ;;  %v568_v59 = vadd.f32 %v440_v47, %v310_v41  ;;  %v313_v60 = vmul.f32 %v972_v0, %v56_v50  ;;  %v186_v63 = vld [vmem:[#allocation6 + $0x68] sm:$0xff]  ;;  %v59_v2 = vld [vmem:[#allocation3 + $0x70] sm:$0xff] }
  0x31   :  { %v443_v61 = vmul.f32 %v974_v1, %v184_v51  ;;  %v314_v62 = vmul.f32 %v972_v0, %v57_v56  ;;  %v187_v3 = vld [vmem:[#allocation6 + $0x70] sm:$0xff]  ;;  %695 = vst [vmem:[#allocation8 + $0x38] sm:$0xff] %v567_v52  ;;  %v569_v4 = vadd.f32 %v441_v53, %v311_v48  ;;  %v444_v6 = vmul.f32 %v974_v1, %v185_v57  ;;  %v60_v8 = vld [vmem:[#allocation3 + $0x78] sm:$0xff]  ;;  %v61_v10 = vld [vmem:[#allocation3 + $0x80] sm:$0xff] }
  0x32   :  { %v570_v5 = vadd.f32 %v442_v55, %v312_v54  ;;  %v315_v7 = vmul.f32 %v972_v0, %v58_v58  ;;  %v188_v9 = vld [vmem:[#allocation6 + $0x78] sm:$0xff]  ;;  %696 = vst [vmem:[#allocation8 + $0x40] sm:$0xff] %v568_v59  ;;  %v445_v12 = vmul.f32 %v974_v1, %v186_v63  ;;  %v316_v13 = vmul.f32 %v972_v0, %v59_v2  ;;  %v189_v15 = vld [vmem:[#allocation6 + $0x80] sm:$0xff]  ;;  %v62_v16 = vld [vmem:[#allocation3 + $0x88] sm:$0xff] }
  0x33   :  { %v571_v11 = vadd.f32 %v443_v61, %v313_v60  ;;  %v446_v14 = vmul.f32 %v974_v1, %v187_v3  ;;  %v190_v17 = vld [vmem:[#allocation6 + $0x88] sm:$0xff]  ;;  %697 = vst [vmem:[#allocation8 + $0x48] sm:$0xff] %v569_v4  ;;  %v572_v18 = vadd.f32 %v444_v6, %v314_v62  ;;  %v317_v19 = vmul.f32 %v972_v0, %v60_v8  ;;  %v63_v22 = vld [vmem:[#allocation3 + $0x90] sm:$0xff]  ;;  %v64_v24 = vld [vmem:[#allocation3 + $0x98] sm:$0xff] }
  0x34   :  { %698 = vst [vmem:[#allocation8 + $0x50] sm:$0xff] %v570_v5  ;;  %v447_v20 = vmul.f32 %v974_v1, %v188_v9  ;;  %v318_v21 = vmul.f32 %v972_v0, %v61_v10  ;;  %v191_v23 = vld [vmem:[#allocation6 + $0x90] sm:$0xff]  ;;  %v573_v25 = vadd.f32 %v445_v12, %v315_v7  ;;  %v448_v27 = vmul.f32 %v974_v1, %v189_v15  ;;  %v192_v29 = vld [vmem:[#allocation6 + $0x98] sm:$0xff]  ;;  %v65_v30 = vld [vmem:[#allocation3 + $0xa0] sm:$0xff] }
  0x35   :  { %699 = vst [vmem:[#allocation8 + $0x58] sm:$0xff] %v571_v11  ;;  %v574_v26 = vadd.f32 %v446_v14, %v316_v13  ;;  %v319_v28 = vmul.f32 %v972_v0, %v62_v16  ;;  %v193_v31 = vld [vmem:[#allocation6 + $0xa0] sm:$0xff]  ;;  %700 = vst [vmem:[#allocation8 + $0x60] sm:$0xff] %v572_v18  ;;  %v449_v33 = vmul.f32 %v974_v1, %v190_v17  ;;  %v66_v36 = vld [vmem:[#allocation3 + $0xa8] sm:$0xff] }
  0x36   :  { %v575_v32 = vadd.f32 %v447_v20, %v317_v19  ;;  %v320_v34 = vmul.f32 %v972_v0, %v63_v22  ;;  %v450_v35 = vmul.f32 %v974_v1, %v191_v23  ;;  %v194_v37 = vld [vmem:[#allocation6 + $0xa8] sm:$0xff]  ;;  %v67_v38 = vld [vmem:[#allocation3 + $0xb0] sm:$0xff]  ;;  %701 = vst [vmem:[#allocation8 + $0x68] sm:$0xff] %v573_v25  ;;  %v576_v39 = vadd.f32 %v448_v27, %v318_v21  ;;  %v68_v44 = vld [vmem:[#allocation3 + $0xb8] sm:$0xff] }
  0x37   :  { %702 = vst [vmem:[#allocation8 + $0x70] sm:$0xff] %v574_v26  ;;  %v321_v40 = vmul.f32 %v972_v0, %v64_v24  ;;  %v451_v41 = vmul.f32 %v974_v1, %v192_v29  ;;  %v322_v42 = vmul.f32 %v972_v0, %v65_v30  ;;  %v195_v43 = vld [vmem:[#allocation6 + $0xb0] sm:$0xff]  ;;  %v196_v45 = vld [vmem:[#allocation6 + $0xb8] sm:$0xff]  ;;  %v577_v46 = vadd.f32 %v449_v33, %v319_v28  ;;  %v69_v50 = vld [vmem:[#allocation3 + $0xc0] sm:$0xff] }
  0x38   :  { %703 = vst [vmem:[#allocation8 + $0x78] sm:$0xff] %v575_v32  ;;  %v578_v47 = vadd.f32 %v450_v35, %v320_v34  ;;  %v452_v48 = vmul.f32 %v974_v1, %v193_v31  ;;  %v323_v49 = vmul.f32 %v972_v0, %v66_v36  ;;  %v197_v51 = vld [vmem:[#allocation6 + $0xc0] sm:$0xff]  ;;  %v70_v52 = vld [vmem:[#allocation3 + $0xc8] sm:$0xff]  ;;  %704 = vst [vmem:[#allocation8 + $0x80] sm:$0xff] %v576_v39 }
  0x39   :  { %v579_v53 = vadd.f32 %v451_v41, %v321_v40  ;;  %v453_v54 = vmul.f32 %v974_v1, %v194_v37  ;;  %v324_v55 = vmul.f32 %v972_v0, %v67_v38  ;;  %v454_v56 = vmul.f32 %v974_v1, %v195_v43  ;;  %v198_v57 = vld [vmem:[#allocation6 + $0xc8] sm:$0xff]  ;;  %v71_v58 = vld [vmem:[#allocation3 + $0xd0] sm:$0xff]  ;;  %705 = vst [vmem:[#allocation8 + $0x88] sm:$0xff] %v577_v46  ;;  %v72_v2 = vld [vmem:[#allocation3 + $0xd8] sm:$0xff] }
  0x3a   :  { %v199_v59 = vld [vmem:[#allocation6 + $0xd0] sm:$0xff]  ;;  %706 = vst [vmem:[#allocation8 + $0x90] sm:$0xff] %v578_v47  ;;  %v580_v60 = vadd.f32 %v452_v48, %v322_v42  ;;  %v325_v61 = vmul.f32 %v972_v0, %v68_v44  ;;  %v455_v62 = vmul.f32 %v974_v1, %v196_v45  ;;  %v326_v63 = vmul.f32 %v972_v0, %v69_v50  ;;  %v200_v3 = vld [vmem:[#allocation6 + $0xd8] sm:$0xff]  ;;  %v73_v4 = vld [vmem:[#allocation3 + $0xe0] sm:$0xff] }
  0x3b   :  { %707 = vst [vmem:[#allocation8 + $0x98] sm:$0xff] %v579_v53  ;;  %v581_v5 = vadd.f32 %v453_v54, %v323_v49  ;;  %v582_v6 = vadd.f32 %v454_v56, %v324_v55  ;;  %v456_v7 = vmul.f32 %v974_v1, %v197_v51  ;;  %v327_v8 = vmul.f32 %v972_v0, %v70_v52  ;;  %v201_v9 = vld [vmem:[#allocation6 + $0xe0] sm:$0xff]  ;;  %v74_v10 = vld [vmem:[#allocation3 + $0xe8] sm:$0xff]  ;;  %v75_v16 = vld [vmem:[#allocation3 + $0xf0] sm:$0xff] }
  0x3c   :  { %708 = vst [vmem:[#allocation8 + $0xa0] sm:$0xff] %v580_v60  ;;  %v583_v11 = vadd.f32 %v455_v62, %v325_v61  ;;  %v457_v12 = vmul.f32 %v974_v1, %v198_v57  ;;  %v328_v13 = vmul.f32 %v972_v0, %v71_v58  ;;  %v458_v14 = vmul.f32 %v974_v1, %v199_v59  ;;  %v202_v15 = vld [vmem:[#allocation6 + $0xe8] sm:$0xff]  ;;  %v203_v17 = vld [vmem:[#allocation6 + $0xf0] sm:$0xff]  ;;  %v76_v22 = vld [vmem:[#allocation3 + $0xf8] sm:$0xff] }
  0x3d   :  { %709 = vst [vmem:[#allocation8 + $0xa8] sm:$0xff] %v581_v5  ;;  %710 = vst [vmem:[#allocation8 + $0xb0] sm:$0xff] %v582_v6  ;;  %v584_v18 = vadd.f32 %v456_v7, %v326_v63  ;;  %v329_v19 = vmul.f32 %v972_v0, %v72_v2  ;;  %v459_v20 = vmul.f32 %v974_v1, %v200_v3  ;;  %v204_v23 = vld [vmem:[#allocation6 + $0xf8] sm:$0xff]  ;;  %v77_v24 = vld [vmem:[#allocation3 + $0x100] sm:$0xff] }
  0x3e   :  { %v330_v21 = vmul.f32 %v972_v0, %v73_v4  ;;  %711 = vst [vmem:[#allocation8 + $0xb8] sm:$0xff] %v583_v11  ;;  %v585_v25 = vadd.f32 %v457_v12, %v327_v8  ;;  %v586_v26 = vadd.f32 %v458_v14, %v328_v13  ;;  %v460_v27 = vmul.f32 %v974_v1, %v201_v9  ;;  %v205_v29 = vld [vmem:[#allocation6 + $0x100] sm:$0xff]  ;;  %v78_v30 = vld [vmem:[#allocation3 + $0x108] sm:$0xff]  ;;  %v79_v36 = vld [vmem:[#allocation3 + $0x110] sm:$0xff] }
  0x3f   :  { %v331_v28 = vmul.f32 %v972_v0, %v74_v10  ;;  %712 = vst [vmem:[#allocation8 + $0xc0] sm:$0xff] %v584_v18  ;;  %v587_v31 = vadd.f32 %v459_v20, %v329_v19  ;;  %v461_v32 = vmul.f32 %v974_v1, %v202_v15  ;;  %v332_v33 = vmul.f32 %v972_v0, %v75_v16  ;;  %v206_v35 = vld [vmem:[#allocation6 + $0x108] sm:$0xff]  ;;  %v207_v37 = vld [vmem:[#allocation6 + $0x110] sm:$0xff]  ;;  %v80_v42 = vld [vmem:[#allocation3 + $0x118] sm:$0xff] }
  0x40   :  { %v462_v34 = vmul.f32 %v974_v1, %v203_v17  ;;  %713 = vst [vmem:[#allocation8 + $0xc8] sm:$0xff] %v585_v25  ;;  %714 = vst [vmem:[#allocation8 + $0xd0] sm:$0xff] %v586_v26  ;;  %v588_v38 = vadd.f32 %v460_v27, %v330_v21  ;;  %v333_v39 = vmul.f32 %v972_v0, %v76_v22  ;;  %v208_v43 = vld [vmem:[#allocation6 + $0x118] sm:$0xff]  ;;  %v81_v44 = vld [vmem:[#allocation3 + $0x120] sm:$0xff] }
  0x41   :  { %v463_v40 = vmul.f32 %v974_v1, %v204_v23  ;;  %v334_v41 = vmul.f32 %v972_v0, %v77_v24  ;;  %715 = vst [vmem:[#allocation8 + $0xd8] sm:$0xff] %v587_v31  ;;  %v589_v45 = vadd.f32 %v461_v32, %v331_v28  ;;  %v464_v47 = vmul.f32 %v974_v1, %v205_v29  ;;  %v209_v49 = vld [vmem:[#allocation6 + $0x120] sm:$0xff]  ;;  %v82_v50 = vld [vmem:[#allocation3 + $0x128] sm:$0xff]  ;;  %v83_v56 = vld [vmem:[#allocation3 + $0x130] sm:$0xff] }
  0x42   :  { %v590_v46 = vadd.f32 %v462_v34, %v332_v33  ;;  %v335_v48 = vmul.f32 %v972_v0, %v78_v30  ;;  %716 = vst [vmem:[#allocation8 + $0xe0] sm:$0xff] %v588_v38  ;;  %v465_v52 = vmul.f32 %v974_v1, %v206_v35  ;;  %v336_v53 = vmul.f32 %v972_v0, %v79_v36  ;;  %v210_v55 = vld [vmem:[#allocation6 + $0x128] sm:$0xff]  ;;  %v211_v57 = vld [vmem:[#allocation6 + $0x130] sm:$0xff]  ;;  %v84_v62 = vld [vmem:[#allocation3 + $0x138] sm:$0xff] }
  0x43   :  { %v591_v51 = vadd.f32 %v463_v40, %v333_v39  ;;  %v466_v54 = vmul.f32 %v974_v1, %v207_v37  ;;  %717 = vst [vmem:[#allocation8 + $0xe8] sm:$0xff] %v589_v45  ;;  %v592_v58 = vadd.f32 %v464_v47, %v334_v41  ;;  %v337_v59 = vmul.f32 %v972_v0, %v80_v42  ;;  %v212_v63 = vld [vmem:[#allocation6 + $0x138] sm:$0xff]  ;;  %v85_v2 = vld [vmem:[#allocation3 + $0x140] sm:$0xff]  ;;  %v86_v8 = vld [vmem:[#allocation3 + $0x148] sm:$0xff] }
  0x44   :  { %718 = vst [vmem:[#allocation8 + $0xf0] sm:$0xff] %v590_v46  ;;  %v467_v60 = vmul.f32 %v974_v1, %v208_v43  ;;  %v338_v61 = vmul.f32 %v972_v0, %v81_v44  ;;  %v593_v3 = vadd.f32 %v465_v52, %v335_v48  ;;  %v468_v5 = vmul.f32 %v974_v1, %v209_v49  ;;  %v213_v7 = vld [vmem:[#allocation6 + $0x140] sm:$0xff]  ;;  %v214_v13 = vld [vmem:[#allocation6 + $0x148] sm:$0xff]  ;;  %v87_v14 = vld [vmem:[#allocation3 + $0x150] sm:$0xff] }
  0x45   :  { %719 = vst [vmem:[#allocation8 + $0xf8] sm:$0xff] %v591_v51  ;;  %v594_v4 = vadd.f32 %v466_v54, %v336_v53  ;;  %v339_v6 = vmul.f32 %v972_v0, %v82_v50  ;;  %720 = vst [vmem:[#allocation8 + $0x100] sm:$0xff] %v592_v58  ;;  %v469_v10 = vmul.f32 %v974_v1, %v210_v55  ;;  %v215_v15 = vld [vmem:[#allocation6 + $0x150] sm:$0xff]  ;;  %v88_v20 = vld [vmem:[#allocation3 + $0x158] sm:$0xff] }
  0x46   :  { %v595_v9 = vadd.f32 %v467_v60, %v337_v59  ;;  %v340_v11 = vmul.f32 %v972_v0, %v83_v56  ;;  %v470_v12 = vmul.f32 %v974_v1, %v211_v57  ;;  %721 = vst [vmem:[#allocation8 + $0x108] sm:$0xff] %v593_v3  ;;  %v596_v16 = vadd.f32 %v468_v5, %v338_v61  ;;  %v216_v21 = vld [vmem:[#allocation6 + $0x158] sm:$0xff]  ;;  %v89_v22 = vld [vmem:[#allocation3 + $0x160] sm:$0xff]  ;;  %v90_v28 = vld [vmem:[#allocation3 + $0x168] sm:$0xff] }
  0x47   :  { %722 = vst [vmem:[#allocation8 + $0x110] sm:$0xff] %v594_v4  ;;  %v341_v17 = vmul.f32 %v972_v0, %v84_v62  ;;  %v471_v18 = vmul.f32 %v974_v1, %v212_v63  ;;  %v342_v19 = vmul.f32 %v972_v0, %v85_v2  ;;  %v597_v23 = vadd.f32 %v469_v10, %v339_v6  ;;  %v217_v27 = vld [vmem:[#allocation6 + $0x160] sm:$0xff]  ;;  %v218_v33 = vld [vmem:[#allocation6 + $0x168] sm:$0xff]  ;;  %v91_v34 = vld [vmem:[#allocation3 + $0x170] sm:$0xff] }
  0x48   :  { %723 = vst [vmem:[#allocation8 + $0x118] sm:$0xff] %v595_v9  ;;  %v598_v24 = vadd.f32 %v470_v12, %v340_v11  ;;  %v472_v25 = vmul.f32 %v974_v1, %v213_v7  ;;  %v343_v26 = vmul.f32 %v972_v0, %v86_v8  ;;  %724 = vst [vmem:[#allocation8 + $0x120] sm:$0xff] %v596_v16  ;;  %v219_v35 = vld [vmem:[#allocation6 + $0x170] sm:$0xff]  ;;  %v92_v40 = vld [vmem:[#allocation3 + $0x178] sm:$0xff] }
  0x49   :  { %v599_v29 = vadd.f32 %v471_v18, %v341_v17  ;;  %v473_v30 = vmul.f32 %v974_v1, %v214_v13  ;;  %v344_v31 = vmul.f32 %v972_v0, %v87_v14  ;;  %v474_v32 = vmul.f32 %v974_v1, %v215_v15  ;;  %725 = vst [vmem:[#allocation8 + $0x128] sm:$0xff] %v597_v23  ;;  %v220_v41 = vld [vmem:[#allocation6 + $0x178] sm:$0xff]  ;;  %v93_v42 = vld [vmem:[#allocation3 + $0x180] sm:$0xff]  ;;  %v94_v48 = vld [vmem:[#allocation3 + $0x188] sm:$0xff] }
  0x4a   :  { %726 = vst [vmem:[#allocation8 + $0x130] sm:$0xff] %v598_v24  ;;  %v600_v36 = vadd.f32 %v472_v25, %v342_v19  ;;  %v345_v37 = vmul.f32 %v972_v0, %v88_v20  ;;  %v475_v38 = vmul.f32 %v974_v1, %v216_v21  ;;  %v346_v39 = vmul.f32 %v972_v0, %v89_v22  ;;  %v221_v47 = vld [vmem:[#allocation6 + $0x180] sm:$0xff]  ;;  %v222_v53 = vld [vmem:[#allocation6 + $0x188] sm:$0xff]  ;;  %v95_v54 = vld [vmem:[#allocation3 + $0x190] sm:$0xff] }
  0x4b   :  { %727 = vst [vmem:[#allocation8 + $0x138] sm:$0xff] %v599_v29  ;;  %v601_v43 = vadd.f32 %v473_v30, %v343_v26  ;;  %v602_v44 = vadd.f32 %v474_v32, %v344_v31  ;;  %v476_v45 = vmul.f32 %v974_v1, %v217_v27  ;;  %v347_v46 = vmul.f32 %v972_v0, %v90_v28  ;;  %v223_v55 = vld [vmem:[#allocation6 + $0x190] sm:$0xff]  ;;  %v96_v60 = vld [vmem:[#allocation3 + $0x198] sm:$0xff]  ;;  %v97_v62 = vld [vmem:[#allocation3 + $0x1a0] sm:$0xff] }
  0x4c   :  { %728 = vst [vmem:[#allocation8 + $0x140] sm:$0xff] %v600_v36  ;;  %v603_v49 = vadd.f32 %v475_v38, %v345_v37  ;;  %v477_v50 = vmul.f32 %v974_v1, %v218_v33  ;;  %v348_v51 = vmul.f32 %v972_v0, %v91_v34  ;;  %v478_v52 = vmul.f32 %v974_v1, %v219_v35  ;;  %v224_v61 = vld [vmem:[#allocation6 + $0x198] sm:$0xff]  ;;  %v225_v5 = vld [vmem:[#allocation6 + $0x1a0] sm:$0xff]  ;;  %v98_v6 = vld [vmem:[#allocation3 + $0x1a8] sm:$0xff] }
  0x4d   :  { %729 = vst [vmem:[#allocation8 + $0x148] sm:$0xff] %v601_v43  ;;  %730 = vst [vmem:[#allocation8 + $0x150] sm:$0xff] %v602_v44  ;;  %v604_v56 = vadd.f32 %v476_v45, %v346_v39  ;;  %v349_v57 = vmul.f32 %v972_v0, %v92_v40  ;;  %v479_v58 = vmul.f32 %v974_v1, %v220_v41  ;;  %v226_v11 = vld [vmem:[#allocation6 + $0x1a8] sm:$0xff]  ;;  %v99_v12 = vld [vmem:[#allocation3 + $0x1b0] sm:$0xff] }
  0x4e   :  { %v350_v59 = vmul.f32 %v972_v0, %v93_v42  ;;  %731 = vst [vmem:[#allocation8 + $0x158] sm:$0xff] %v603_v49  ;;  %v605_v63 = vadd.f32 %v477_v50, %v347_v46  ;;  %v606_v2 = vadd.f32 %v478_v52, %v348_v51  ;;  %v480_v3 = vmul.f32 %v974_v1, %v221_v47  ;;  %v227_v13 = vld [vmem:[#allocation6 + $0x1b0] sm:$0xff]  ;;  %v100_v18 = vld [vmem:[#allocation3 + $0x1b8] sm:$0xff]  ;;  %v101_v20 = vld [vmem:[#allocation3 + $0x1c0] sm:$0xff] }
  0x4f   :  { %v351_v4 = vmul.f32 %v972_v0, %v94_v48  ;;  %732 = vst [vmem:[#allocation8 + $0x160] sm:$0xff] %v604_v56  ;;  %v607_v7 = vadd.f32 %v479_v58, %v349_v57  ;;  %v481_v8 = vmul.f32 %v974_v1, %v222_v53  ;;  %v352_v9 = vmul.f32 %v972_v0, %v95_v54  ;;  %v228_v19 = vld [vmem:[#allocation6 + $0x1b8] sm:$0xff]  ;;  %v229_v25 = vld [vmem:[#allocation6 + $0x1c0] sm:$0xff]  ;;  %v102_v26 = vld [vmem:[#allocation3 + $0x1c8] sm:$0xff] }
  0x50   :  { %v482_v10 = vmul.f32 %v974_v1, %v223_v55  ;;  %733 = vst [vmem:[#allocation8 + $0x168] sm:$0xff] %v605_v63  ;;  %734 = vst [vmem:[#allocation8 + $0x170] sm:$0xff] %v606_v2  ;;  %v608_v14 = vadd.f32 %v480_v3, %v350_v59  ;;  %v353_v15 = vmul.f32 %v972_v0, %v96_v60  ;;  %v230_v31 = vld [vmem:[#allocation6 + $0x1c8] sm:$0xff]  ;;  %v103_v32 = vld [vmem:[#allocation3 + $0x1d0] sm:$0xff] }
  0x51   :  { %v483_v16 = vmul.f32 %v974_v1, %v224_v61  ;;  %v354_v17 = vmul.f32 %v972_v0, %v97_v62  ;;  %735 = vst [vmem:[#allocation8 + $0x178] sm:$0xff] %v607_v7  ;;  %v609_v21 = vadd.f32 %v481_v8, %v351_v4  ;;  %v484_v23 = vmul.f32 %v974_v1, %v225_v5  ;;  %v231_v33 = vld [vmem:[#allocation6 + $0x1d0] sm:$0xff]  ;;  %v104_v38 = vld [vmem:[#allocation3 + $0x1d8] sm:$0xff]  ;;  %v105_v40 = vld [vmem:[#allocation3 + $0x1e0] sm:$0xff] }
  0x52   :  { %v610_v22 = vadd.f32 %v482_v10, %v352_v9  ;;  %v355_v24 = vmul.f32 %v972_v0, %v98_v6  ;;  %736 = vst [vmem:[#allocation8 + $0x180] sm:$0xff] %v608_v14  ;;  %v485_v28 = vmul.f32 %v974_v1, %v226_v11  ;;  %v356_v29 = vmul.f32 %v972_v0, %v99_v12  ;;  %v232_v39 = vld [vmem:[#allocation6 + $0x1d8] sm:$0xff]  ;;  %v233_v45 = vld [vmem:[#allocation6 + $0x1e0] sm:$0xff]  ;;  %v106_v46 = vld [vmem:[#allocation3 + $0x1e8] sm:$0xff] }
  0x53   :  { %v611_v27 = vadd.f32 %v483_v16, %v353_v15  ;;  %v486_v30 = vmul.f32 %v974_v1, %v227_v13  ;;  %737 = vst [vmem:[#allocation8 + $0x188] sm:$0xff] %v609_v21  ;;  %v612_v34 = vadd.f32 %v484_v23, %v354_v17  ;;  %v357_v35 = vmul.f32 %v972_v0, %v100_v18  ;;  %v234_v51 = vld [vmem:[#allocation6 + $0x1e8] sm:$0xff]  ;;  %v107_v52 = vld [vmem:[#allocation3 + $0x1f0] sm:$0xff]  ;;  %v108_v58 = vld [vmem:[#allocation3 + $0x1f8] sm:$0xff] }
  0x54   :  { %738 = vst [vmem:[#allocation8 + $0x190] sm:$0xff] %v610_v22  ;;  %v487_v36 = vmul.f32 %v974_v1, %v228_v19  ;;  %v358_v37 = vmul.f32 %v972_v0, %v101_v20  ;;  %v613_v41 = vadd.f32 %v485_v28, %v355_v24  ;;  %v488_v43 = vmul.f32 %v974_v1, %v229_v25  ;;  %v235_v53 = vld [vmem:[#allocation6 + $0x1f0] sm:$0xff]  ;;  %v236_v59 = vld [vmem:[#allocation6 + $0x1f8] sm:$0xff]  ;;  %v109_v60 = vld [vmem:[#allocation3 + $0x200] sm:$0xff] }
  0x55   :  { %739 = vst [vmem:[#allocation8 + $0x198] sm:$0xff] %v611_v27  ;;  %v614_v42 = vadd.f32 %v486_v30, %v356_v29  ;;  %v359_v44 = vmul.f32 %v972_v0, %v102_v26  ;;  %740 = vst [vmem:[#allocation8 + $0x1a0] sm:$0xff] %v612_v34  ;;  %v489_v48 = vmul.f32 %v974_v1, %v230_v31  ;;  %v237_v3 = vld [vmem:[#allocation6 + $0x200] sm:$0xff]  ;;  %v110_v4 = vld [vmem:[#allocation3 + $0x208] sm:$0xff] }
  0x56   :  { %v615_v47 = vadd.f32 %v487_v36, %v357_v35  ;;  %v360_v49 = vmul.f32 %v972_v0, %v103_v32  ;;  %v490_v50 = vmul.f32 %v974_v1, %v231_v33  ;;  %741 = vst [vmem:[#allocation8 + $0x1a8] sm:$0xff] %v613_v41  ;;  %v616_v54 = vadd.f32 %v488_v43, %v358_v37  ;;  %v238_v9 = vld [vmem:[#allocation6 + $0x208] sm:$0xff]  ;;  %v111_v10 = vld [vmem:[#allocation3 + $0x210] sm:$0xff]  ;;  %v112_v16 = vld [vmem:[#allocation3 + $0x218] sm:$0xff] }
  0x57   :  { %742 = vst [vmem:[#allocation8 + $0x1b0] sm:$0xff] %v614_v42  ;;  %v361_v55 = vmul.f32 %v972_v0, %v104_v38  ;;  %v491_v56 = vmul.f32 %v974_v1, %v232_v39  ;;  %v362_v57 = vmul.f32 %v972_v0, %v105_v40  ;;  %v617_v61 = vadd.f32 %v489_v48, %v359_v44  ;;  %v239_v11 = vld [vmem:[#allocation6 + $0x210] sm:$0xff]  ;;  %v240_v17 = vld [vmem:[#allocation6 + $0x218] sm:$0xff]  ;;  %v113_v18 = vld [vmem:[#allocation3 + $0x220] sm:$0xff] }
  0x58   :  { %743 = vst [vmem:[#allocation8 + $0x1b8] sm:$0xff] %v615_v47  ;;  %v618_v62 = vadd.f32 %v490_v50, %v360_v49  ;;  %v492_v63 = vmul.f32 %v974_v1, %v233_v45  ;;  %v363_v2 = vmul.f32 %v972_v0, %v106_v46  ;;  %744 = vst [vmem:[#allocation8 + $0x1c0] sm:$0xff] %v616_v54  ;;  %v241_v23 = vld [vmem:[#allocation6 + $0x220] sm:$0xff]  ;;  %v114_v24 = vld [vmem:[#allocation3 + $0x228] sm:$0xff] }
  0x59   :  { %v619_v5 = vadd.f32 %v491_v56, %v361_v55  ;;  %v493_v6 = vmul.f32 %v974_v1, %v234_v51  ;;  %v364_v7 = vmul.f32 %v972_v0, %v107_v52  ;;  %v494_v8 = vmul.f32 %v974_v1, %v235_v53  ;;  %745 = vst [vmem:[#allocation8 + $0x1c8] sm:$0xff] %v617_v61  ;;  %v242_v29 = vld [vmem:[#allocation6 + $0x228] sm:$0xff]  ;;  %v115_v30 = vld [vmem:[#allocation3 + $0x230] sm:$0xff]  ;;  %v116_v36 = vld [vmem:[#allocation3 + $0x238] sm:$0xff] }
  0x5a   :  { %746 = vst [vmem:[#allocation8 + $0x1d0] sm:$0xff] %v618_v62  ;;  %v620_v12 = vadd.f32 %v492_v63, %v362_v57  ;;  %v365_v13 = vmul.f32 %v972_v0, %v108_v58  ;;  %v495_v14 = vmul.f32 %v974_v1, %v236_v59  ;;  %v366_v15 = vmul.f32 %v972_v0, %v109_v60  ;;  %v243_v31 = vld [vmem:[#allocation6 + $0x230] sm:$0xff]  ;;  %v244_v37 = vld [vmem:[#allocation6 + $0x238] sm:$0xff]  ;;  %v117_v38 = vld [vmem:[#allocation3 + $0x240] sm:$0xff] }
  0x5b   :  { %747 = vst [vmem:[#allocation8 + $0x1d8] sm:$0xff] %v619_v5  ;;  %v621_v19 = vadd.f32 %v493_v6, %v363_v2  ;;  %v622_v20 = vadd.f32 %v494_v8, %v364_v7  ;;  %v496_v21 = vmul.f32 %v974_v1, %v237_v3  ;;  %v367_v22 = vmul.f32 %v972_v0, %v110_v4  ;;  %v245_v43 = vld [vmem:[#allocation6 + $0x240] sm:$0xff]  ;;  %v118_v44 = vld [vmem:[#allocation3 + $0x248] sm:$0xff]  ;;  %v119_v50 = vld [vmem:[#allocation3 + $0x250] sm:$0xff] }
  0x5c   :  { %748 = vst [vmem:[#allocation8 + $0x1e0] sm:$0xff] %v620_v12  ;;  %v623_v25 = vadd.f32 %v495_v14, %v365_v13  ;;  %v497_v26 = vmul.f32 %v974_v1, %v238_v9  ;;  %v368_v27 = vmul.f32 %v972_v0, %v111_v10  ;;  %v498_v28 = vmul.f32 %v974_v1, %v239_v11  ;;  %v246_v49 = vld [vmem:[#allocation6 + $0x248] sm:$0xff]  ;;  %v247_v51 = vld [vmem:[#allocation6 + $0x250] sm:$0xff]  ;;  %v120_v56 = vld [vmem:[#allocation3 + $0x258] sm:$0xff] }
  0x5d   :  { %749 = vst [vmem:[#allocation8 + $0x1e8] sm:$0xff] %v621_v19  ;;  %750 = vst [vmem:[#allocation8 + $0x1f0] sm:$0xff] %v622_v20  ;;  %v624_v32 = vadd.f32 %v496_v21, %v366_v15  ;;  %v369_v33 = vmul.f32 %v972_v0, %v112_v16  ;;  %v499_v34 = vmul.f32 %v974_v1, %v240_v17  ;;  %v248_v57 = vld [vmem:[#allocation6 + $0x258] sm:$0xff]  ;;  %v121_v58 = vld [vmem:[#allocation3 + $0x260] sm:$0xff] }
  0x5e   :  { %v370_v35 = vmul.f32 %v972_v0, %v113_v18  ;;  %751 = vst [vmem:[#allocation8 + $0x1f8] sm:$0xff] %v623_v25  ;;  %v625_v39 = vadd.f32 %v497_v26, %v367_v22  ;;  %v626_v40 = vadd.f32 %v498_v28, %v368_v27  ;;  %v500_v41 = vmul.f32 %v974_v1, %v241_v23  ;;  %v249_v63 = vld [vmem:[#allocation6 + $0x260] sm:$0xff]  ;;  %v122_v2 = vld [vmem:[#allocation3 + $0x268] sm:$0xff]  ;;  %v123_v8 = vld [vmem:[#allocation3 + $0x270] sm:$0xff] }
  0x5f   :  { %v371_v42 = vmul.f32 %v972_v0, %v114_v24  ;;  %752 = vst [vmem:[#allocation8 + $0x200] sm:$0xff] %v624_v32  ;;  %v627_v45 = vadd.f32 %v499_v34, %v369_v33  ;;  %v501_v46 = vmul.f32 %v974_v1, %v242_v29  ;;  %v372_v47 = vmul.f32 %v972_v0, %v115_v30  ;;  %v250_v7 = vld [vmem:[#allocation6 + $0x268] sm:$0xff]  ;;  %v251_v9 = vld [vmem:[#allocation6 + $0x270] sm:$0xff]  ;;  %v124_v14 = vld [vmem:[#allocation3 + $0x278] sm:$0xff] }
  0x60   :  { %v502_v48 = vmul.f32 %v974_v1, %v243_v31  ;;  %753 = vst [vmem:[#allocation8 + $0x208] sm:$0xff] %v625_v39  ;;  %754 = vst [vmem:[#allocation8 + $0x210] sm:$0xff] %v626_v40  ;;  %v628_v52 = vadd.f32 %v500_v41, %v370_v35  ;;  %v373_v53 = vmul.f32 %v972_v0, %v116_v36  ;;  %v252_v15 = vld [vmem:[#allocation6 + $0x278] sm:$0xff]  ;;  %v125_v16 = vld [vmem:[#allocation3 + $0x280] sm:$0xff] }
  0x61   :  { %v503_v54 = vmul.f32 %v974_v1, %v244_v37  ;;  %v374_v55 = vmul.f32 %v972_v0, %v117_v38  ;;  %755 = vst [vmem:[#allocation8 + $0x218] sm:$0xff] %v627_v45  ;;  %v629_v59 = vadd.f32 %v501_v46, %v371_v42  ;;  %v504_v61 = vmul.f32 %v974_v1, %v245_v43  ;;  %v253_v21 = vld [vmem:[#allocation6 + $0x280] sm:$0xff]  ;;  %v126_v22 = vld [vmem:[#allocation3 + $0x288] sm:$0xff]  ;;  %v127_v28 = vld [vmem:[#allocation3 + $0x290] sm:$0xff] }
  0x62   :  { %v630_v60 = vadd.f32 %v502_v48, %v372_v47  ;;  %v375_v62 = vmul.f32 %v972_v0, %v118_v44  ;;  %756 = vst [vmem:[#allocation8 + $0x220] sm:$0xff] %v628_v52  ;;  %v505_v4 = vmul.f32 %v974_v1, %v246_v49  ;;  %v376_v5 = vmul.f32 %v972_v0, %v119_v50  ;;  %v254_v27 = vld [vmem:[#allocation6 + $0x288] sm:$0xff]  ;;  %v255_v29 = vld [vmem:[#allocation6 + $0x290] sm:$0xff]  ;;  %v128_v34 = vld [vmem:[#allocation3 + $0x298] sm:$0xff] }
  0x63   :  { %v631_v3 = vadd.f32 %v503_v54, %v373_v53  ;;  %v506_v6 = vmul.f32 %v974_v1, %v247_v51  ;;  %757 = vst [vmem:[#allocation8 + $0x228] sm:$0xff] %v629_v59  ;;  %v632_v10 = vadd.f32 %v504_v61, %v374_v55  ;;  %v377_v11 = vmul.f32 %v972_v0, %v120_v56  ;;  %v256_v35 = vld [vmem:[#allocation6 + $0x298] sm:$0xff]  ;;  %v129_v36 = vld [vmem:[#allocation3 + $0x2a0] sm:$0xff]  ;;  %v130_v42 = vld [vmem:[#allocation3 + $0x2a8] sm:$0xff] }
  0x64   :  { %758 = vst [vmem:[#allocation8 + $0x230] sm:$0xff] %v630_v60  ;;  %v507_v12 = vmul.f32 %v974_v1, %v248_v57  ;;  %v378_v13 = vmul.f32 %v972_v0, %v121_v58  ;;  %v633_v17 = vadd.f32 %v505_v4, %v375_v62  ;;  %v508_v19 = vmul.f32 %v974_v1, %v249_v63  ;;  %v257_v41 = vld [vmem:[#allocation6 + $0x2a0] sm:$0xff]  ;;  %v258_v47 = vld [vmem:[#allocation6 + $0x2a8] sm:$0xff]  ;;  %v131_v48 = vld [vmem:[#allocation3 + $0x2b0] sm:$0xff] }
  0x65   :  { %759 = vst [vmem:[#allocation8 + $0x238] sm:$0xff] %v631_v3  ;;  %v634_v18 = vadd.f32 %v506_v6, %v376_v5  ;;  %v379_v20 = vmul.f32 %v972_v0, %v122_v2  ;;  %760 = vst [vmem:[#allocation8 + $0x240] sm:$0xff] %v632_v10  ;;  %v509_v24 = vmul.f32 %v974_v1, %v250_v7  ;;  %v259_v49 = vld [vmem:[#allocation6 + $0x2b0] sm:$0xff]  ;;  %v132_v54 = vld [vmem:[#allocation3 + $0x2b8] sm:$0xff] }
  0x66   :  { %v635_v23 = vadd.f32 %v507_v12, %v377_v11  ;;  %v380_v25 = vmul.f32 %v972_v0, %v123_v8  ;;  %v510_v26 = vmul.f32 %v974_v1, %v251_v9  ;;  %761 = vst [vmem:[#allocation8 + $0x248] sm:$0xff] %v633_v17  ;;  %v636_v30 = vadd.f32 %v508_v19, %v378_v13  ;;  %v260_v55 = vld [vmem:[#allocation6 + $0x2b8] sm:$0xff]  ;;  %v133_v56 = vld [vmem:[#allocation3 + $0x2c0] sm:$0xff]  ;;  %v134_v62 = vld [vmem:[#allocation3 + $0x2c8] sm:$0xff] }
  0x67   :  { %762 = vst [vmem:[#allocation8 + $0x250] sm:$0xff] %v634_v18  ;;  %v381_v31 = vmul.f32 %v972_v0, %v124_v14  ;;  %v511_v32 = vmul.f32 %v974_v1, %v252_v15  ;;  %v382_v33 = vmul.f32 %v972_v0, %v125_v16  ;;  %v637_v37 = vadd.f32 %v509_v24, %v379_v20  ;;  %v261_v61 = vld [vmem:[#allocation6 + $0x2c0] sm:$0xff]  ;;  %v262_v5 = vld [vmem:[#allocation6 + $0x2c8] sm:$0xff]  ;;  %v135_v6 = vld [vmem:[#allocation3 + $0x2d0] sm:$0xff] }
  0x68   :  { %763 = vst [vmem:[#allocation8 + $0x258] sm:$0xff] %v635_v23  ;;  %v638_v38 = vadd.f32 %v510_v26, %v380_v25  ;;  %v512_v39 = vmul.f32 %v974_v1, %v253_v21  ;;  %v383_v40 = vmul.f32 %v972_v0, %v126_v22  ;;  %764 = vst [vmem:[#allocation8 + $0x260] sm:$0xff] %v636_v30  ;;  %v263_v7 = vld [vmem:[#allocation6 + $0x2d0] sm:$0xff]  ;;  %v136_v12 = vld [vmem:[#allocation3 + $0x2d8] sm:$0xff] }
  0x69   :  { %v639_v43 = vadd.f32 %v511_v32, %v381_v31  ;;  %v513_v44 = vmul.f32 %v974_v1, %v254_v27  ;;  %v384_v45 = vmul.f32 %v972_v0, %v127_v28  ;;  %v514_v46 = vmul.f32 %v974_v1, %v255_v29  ;;  %765 = vst [vmem:[#allocation8 + $0x268] sm:$0xff] %v637_v37  ;;  %v264_v13 = vld [vmem:[#allocation6 + $0x2d8] sm:$0xff]  ;;  %v137_v14 = vld [vmem:[#allocation3 + $0x2e0] sm:$0xff]  ;;  %v138_v20 = vld [vmem:[#allocation3 + $0x2e8] sm:$0xff] }
  0x6a   :  { %766 = vst [vmem:[#allocation8 + $0x270] sm:$0xff] %v638_v38  ;;  %v640_v50 = vadd.f32 %v512_v39, %v382_v33  ;;  %v385_v51 = vmul.f32 %v972_v0, %v128_v34  ;;  %v515_v52 = vmul.f32 %v974_v1, %v256_v35  ;;  %v386_v53 = vmul.f32 %v972_v0, %v129_v36  ;;  %v265_v19 = vld [vmem:[#allocation6 + $0x2e0] sm:$0xff]  ;;  %v266_v25 = vld [vmem:[#allocation6 + $0x2e8] sm:$0xff]  ;;  %v139_v26 = vld [vmem:[#allocation3 + $0x2f0] sm:$0xff] }
  0x6b   :  { %767 = vst [vmem:[#allocation8 + $0x278] sm:$0xff] %v639_v43  ;;  %v641_v57 = vadd.f32 %v513_v44, %v383_v40  ;;  %v642_v58 = vadd.f32 %v514_v46, %v384_v45  ;;  %v516_v59 = vmul.f32 %v974_v1, %v257_v41  ;;  %v387_v60 = vmul.f32 %v972_v0, %v130_v42  ;;  %v267_v27 = vld [vmem:[#allocation6 + $0x2f0] sm:$0xff]  ;;  %v140_v32 = vld [vmem:[#allocation3 + $0x2f8] sm:$0xff]  ;;  %v141_v34 = vld [vmem:[#allocation3 + $0x300] sm:$0xff] }
  0x6c   :  { %768 = vst [vmem:[#allocation8 + $0x280] sm:$0xff] %v640_v50  ;;  %v643_v63 = vadd.f32 %v515_v52, %v385_v51  ;;  %v517_v2 = vmul.f32 %v974_v1, %v258_v47  ;;  %v388_v3 = vmul.f32 %v972_v0, %v131_v48  ;;  %v518_v4 = vmul.f32 %v974_v1, %v259_v49  ;;  %v268_v33 = vld [vmem:[#allocation6 + $0x2f8] sm:$0xff]  ;;  %v269_v39 = vld [vmem:[#allocation6 + $0x300] sm:$0xff]  ;;  %v142_v40 = vld [vmem:[#allocation3 + $0x308] sm:$0xff] }
  0x6d   :  { %769 = vst [vmem:[#allocation8 + $0x288] sm:$0xff] %v641_v57  ;;  %770 = vst [vmem:[#allocation8 + $0x290] sm:$0xff] %v642_v58  ;;  %v644_v8 = vadd.f32 %v516_v59, %v386_v53  ;;  %v389_v9 = vmul.f32 %v972_v0, %v132_v54  ;;  %v519_v10 = vmul.f32 %v974_v1, %v260_v55  ;;  %v270_v45 = vld [vmem:[#allocation6 + $0x308] sm:$0xff]  ;;  %v143_v46 = vld [vmem:[#allocation3 + $0x310] sm:$0xff] }
  0x6e   :  { %v390_v11 = vmul.f32 %v972_v0, %v133_v56  ;;  %771 = vst [vmem:[#allocation8 + $0x298] sm:$0xff] %v643_v63  ;;  %v645_v15 = vadd.f32 %v517_v2, %v387_v60  ;;  %v646_v16 = vadd.f32 %v518_v4, %v388_v3  ;;  %v520_v17 = vmul.f32 %v974_v1, %v261_v61  ;;  %v271_v47 = vld [vmem:[#allocation6 + $0x310] sm:$0xff]  ;;  %v144_v52 = vld [vmem:[#allocation3 + $0x318] sm:$0xff]  ;;  %v145_v54 = vld [vmem:[#allocation3 + $0x320] sm:$0xff] }
  0x6f   :  { %v391_v18 = vmul.f32 %v972_v0, %v134_v62  ;;  %772 = vst [vmem:[#allocation8 + $0x2a0] sm:$0xff] %v644_v8  ;;  %v647_v21 = vadd.f32 %v519_v10, %v389_v9  ;;  %v521_v22 = vmul.f32 %v974_v1, %v262_v5  ;;  %v392_v23 = vmul.f32 %v972_v0, %v135_v6  ;;  %v272_v53 = vld [vmem:[#allocation6 + $0x318] sm:$0xff]  ;;  %v273_v59 = vld [vmem:[#allocation6 + $0x320] sm:$0xff]  ;;  %v146_v60 = vld [vmem:[#allocation3 + $0x328] sm:$0xff] }
  0x70   :  { %v522_v24 = vmul.f32 %v974_v1, %v263_v7  ;;  %773 = vst [vmem:[#allocation8 + $0x2a8] sm:$0xff] %v645_v15  ;;  %774 = vst [vmem:[#allocation8 + $0x2b0] sm:$0xff] %v646_v16  ;;  %v648_v28 = vadd.f32 %v520_v17, %v390_v11  ;;  %v393_v29 = vmul.f32 %v972_v0, %v136_v12  ;;  %v274_v3 = vld [vmem:[#allocation6 + $0x328] sm:$0xff]  ;;  %v147_v4 = vld [vmem:[#allocation3 + $0x330] sm:$0xff] }
  0x71   :  { %v523_v30 = vmul.f32 %v974_v1, %v264_v13  ;;  %v394_v31 = vmul.f32 %v972_v0, %v137_v14  ;;  %775 = vst [vmem:[#allocation8 + $0x2b8] sm:$0xff] %v647_v21  ;;  %v649_v35 = vadd.f32 %v521_v22, %v391_v18  ;;  %v524_v37 = vmul.f32 %v974_v1, %v265_v19  ;;  %v275_v5 = vld [vmem:[#allocation6 + $0x330] sm:$0xff]  ;;  %v148_v10 = vld [vmem:[#allocation3 + $0x338] sm:$0xff]  ;;  %v149_v12 = vld [vmem:[#allocation3 + $0x340] sm:$0xff] }
  0x72   :  { %v650_v36 = vadd.f32 %v522_v24, %v392_v23  ;;  %v395_v38 = vmul.f32 %v972_v0, %v138_v20  ;;  %776 = vst [vmem:[#allocation8 + $0x2c0] sm:$0xff] %v648_v28  ;;  %v525_v42 = vmul.f32 %v974_v1, %v266_v25  ;;  %v396_v43 = vmul.f32 %v972_v0, %v139_v26  ;;  %v276_v11 = vld [vmem:[#allocation6 + $0x338] sm:$0xff]  ;;  %v277_v17 = vld [vmem:[#allocation6 + $0x340] sm:$0xff]  ;;  %v150_v18 = vld [vmem:[#allocation3 + $0x348] sm:$0xff] }
  0x73   :  { %v651_v41 = vadd.f32 %v523_v30, %v393_v29  ;;  %v526_v44 = vmul.f32 %v974_v1, %v267_v27  ;;  %777 = vst [vmem:[#allocation8 + $0x2c8] sm:$0xff] %v649_v35  ;;  %v652_v48 = vadd.f32 %v524_v37, %v394_v31  ;;  %v397_v49 = vmul.f32 %v972_v0, %v140_v32  ;;  %v278_v23 = vld [vmem:[#allocation6 + $0x348] sm:$0xff]  ;;  %v151_v24 = vld [vmem:[#allocation3 + $0x350] sm:$0xff]  ;;  %v152_v30 = vld [vmem:[#allocation3 + $0x358] sm:$0xff] }
  0x74   :  { %778 = vst [vmem:[#allocation8 + $0x2d0] sm:$0xff] %v650_v36  ;;  %v527_v50 = vmul.f32 %v974_v1, %v268_v33  ;;  %v398_v51 = vmul.f32 %v972_v0, %v141_v34  ;;  %v653_v55 = vadd.f32 %v525_v42, %v395_v38  ;;  %v528_v57 = vmul.f32 %v974_v1, %v269_v39  ;;  %v279_v25 = vld [vmem:[#allocation6 + $0x350] sm:$0xff]  ;;  %v280_v31 = vld [vmem:[#allocation6 + $0x358] sm:$0xff]  ;;  %v153_v32 = vld [vmem:[#allocation3 + $0x360] sm:$0xff] }
  0x75   :  { %779 = vst [vmem:[#allocation8 + $0x2d8] sm:$0xff] %v651_v41  ;;  %v654_v56 = vadd.f32 %v526_v44, %v396_v43  ;;  %v399_v58 = vmul.f32 %v972_v0, %v142_v40  ;;  %780 = vst [vmem:[#allocation8 + $0x2e0] sm:$0xff] %v652_v48  ;;  %v529_v62 = vmul.f32 %v974_v1, %v270_v45  ;;  %v281_v37 = vld [vmem:[#allocation6 + $0x360] sm:$0xff]  ;;  %v154_v38 = vld [vmem:[#allocation3 + $0x368] sm:$0xff] }
  0x76   :  { %v655_v61 = vadd.f32 %v527_v50, %v397_v49  ;;  %v400_v63 = vmul.f32 %v972_v0, %v143_v46  ;;  %v530_v2 = vmul.f32 %v974_v1, %v271_v47  ;;  %781 = vst [vmem:[#allocation8 + $0x2e8] sm:$0xff] %v653_v55  ;;  %v656_v6 = vadd.f32 %v528_v57, %v398_v51  ;;  %v282_v43 = vld [vmem:[#allocation6 + $0x368] sm:$0xff]  ;;  %v155_v44 = vld [vmem:[#allocation3 + $0x370] sm:$0xff]  ;;  %v156_v50 = vld [vmem:[#allocation3 + $0x378] sm:$0xff] }
  0x77   :  { %782 = vst [vmem:[#allocation8 + $0x2f0] sm:$0xff] %v654_v56  ;;  %v401_v7 = vmul.f32 %v972_v0, %v144_v52  ;;  %v531_v8 = vmul.f32 %v974_v1, %v272_v53  ;;  %v402_v9 = vmul.f32 %v972_v0, %v145_v54  ;;  %v657_v13 = vadd.f32 %v529_v62, %v399_v58  ;;  %v283_v45 = vld [vmem:[#allocation6 + $0x370] sm:$0xff]  ;;  %v284_v51 = vld [vmem:[#allocation6 + $0x378] sm:$0xff]  ;;  %v157_v52 = vld [vmem:[#allocation3 + $0x380] sm:$0xff] }
  0x78   :  { %783 = vst [vmem:[#allocation8 + $0x2f8] sm:$0xff] %v655_v61  ;;  %v658_v14 = vadd.f32 %v530_v2, %v400_v63  ;;  %v532_v15 = vmul.f32 %v974_v1, %v273_v59  ;;  %v403_v16 = vmul.f32 %v972_v0, %v146_v60  ;;  %784 = vst [vmem:[#allocation8 + $0x300] sm:$0xff] %v656_v6  ;;  %v285_v57 = vld [vmem:[#allocation6 + $0x380] sm:$0xff]  ;;  %v158_v58 = vld [vmem:[#allocation3 + $0x388] sm:$0xff] }
  0x79   :  { %v659_v19 = vadd.f32 %v531_v8, %v401_v7  ;;  %v533_v20 = vmul.f32 %v974_v1, %v274_v3  ;;  %v404_v21 = vmul.f32 %v972_v0, %v147_v4  ;;  %v534_v22 = vmul.f32 %v974_v1, %v275_v5  ;;  %785 = vst [vmem:[#allocation8 + $0x308] sm:$0xff] %v657_v13  ;;  %v286_v63 = vld [vmem:[#allocation6 + $0x388] sm:$0xff]  ;;  %v159_v2 = vld [vmem:[#allocation3 + $0x390] sm:$0xff]  ;;  %v160_v8 = vld [vmem:[#allocation3 + $0x398] sm:$0xff] }
  0x7a   :  { %786 = vst [vmem:[#allocation8 + $0x310] sm:$0xff] %v658_v14  ;;  %v660_v26 = vadd.f32 %v532_v15, %v402_v9  ;;  %v405_v27 = vmul.f32 %v972_v0, %v148_v10  ;;  %v535_v28 = vmul.f32 %v974_v1, %v276_v11  ;;  %v406_v29 = vmul.f32 %v972_v0, %v149_v12  ;;  %v287_v3 = vld [vmem:[#allocation6 + $0x390] sm:$0xff]  ;;  %v288_v9 = vld [vmem:[#allocation6 + $0x398] sm:$0xff]  ;;  %v161_v10 = vld [vmem:[#allocation3 + $0x3a0] sm:$0xff] }
  0x7b   :  { %787 = vst [vmem:[#allocation8 + $0x318] sm:$0xff] %v659_v19  ;;  %v661_v33 = vadd.f32 %v533_v20, %v403_v16  ;;  %v662_v34 = vadd.f32 %v534_v22, %v404_v21  ;;  %v536_v35 = vmul.f32 %v974_v1, %v277_v17  ;;  %v407_v36 = vmul.f32 %v972_v0, %v150_v18  ;;  %v289_v15 = vld [vmem:[#allocation6 + $0x3a0] sm:$0xff]  ;;  %v162_v16 = vld [vmem:[#allocation3 + $0x3a8] sm:$0xff]  ;;  %v163_v22 = vld [vmem:[#allocation3 + $0x3b0] sm:$0xff] }
  0x7c   :  { %788 = vst [vmem:[#allocation8 + $0x320] sm:$0xff] %v660_v26  ;;  %v663_v39 = vadd.f32 %v535_v28, %v405_v27  ;;  %v537_v40 = vmul.f32 %v974_v1, %v278_v23  ;;  %v408_v41 = vmul.f32 %v972_v0, %v151_v24  ;;  %v538_v42 = vmul.f32 %v974_v1, %v279_v25  ;;  %v290_v21 = vld [vmem:[#allocation6 + $0x3a8] sm:$0xff]  ;;  %v291_v23 = vld [vmem:[#allocation6 + $0x3b0] sm:$0xff]  ;;  %v164_v28 = vld [vmem:[#allocation3 + $0x3b8] sm:$0xff] }
  0x7d   :  { %789 = vst [vmem:[#allocation8 + $0x328] sm:$0xff] %v661_v33  ;;  %790 = vst [vmem:[#allocation8 + $0x330] sm:$0xff] %v662_v34  ;;  %v664_v46 = vadd.f32 %v536_v35, %v406_v29  ;;  %v409_v47 = vmul.f32 %v972_v0, %v152_v30  ;;  %v539_v48 = vmul.f32 %v974_v1, %v280_v31  ;;  %v292_v29 = vld [vmem:[#allocation6 + $0x3b8] sm:$0xff]  ;;  %v165_v30 = vld [vmem:[#allocation3 + $0x3c0] sm:$0xff] }
  0x7e   :  { %v410_v49 = vmul.f32 %v972_v0, %v153_v32  ;;  %791 = vst [vmem:[#allocation8 + $0x338] sm:$0xff] %v663_v39  ;;  %v665_v53 = vadd.f32 %v537_v40, %v407_v36  ;;  %v666_v54 = vadd.f32 %v538_v42, %v408_v41  ;;  %v540_v55 = vmul.f32 %v974_v1, %v281_v37  ;;  %v293_v35 = vld [vmem:[#allocation6 + $0x3c0] sm:$0xff]  ;;  %v166_v36 = vld [vmem:[#allocation3 + $0x3c8] sm:$0xff]  ;;  %v167_v42 = vld [vmem:[#allocation3 + $0x3d0] sm:$0xff] }
  0x7f   :  { %v411_v56 = vmul.f32 %v972_v0, %v154_v38  ;;  %792 = vst [vmem:[#allocation8 + $0x340] sm:$0xff] %v664_v46  ;;  %v667_v59 = vadd.f32 %v539_v48, %v409_v47  ;;  %v541_v60 = vmul.f32 %v974_v1, %v282_v43  ;;  %v412_v61 = vmul.f32 %v972_v0, %v155_v44  ;;  %v294_v41 = vld [vmem:[#allocation6 + $0x3c8] sm:$0xff]  ;;  %v295_v43 = vld [vmem:[#allocation6 + $0x3d0] sm:$0xff]  ;;  %v168_v48 = vld [vmem:[#allocation3 + $0x3d8] sm:$0xff] }
  0x80   :  { %v542_v62 = vmul.f32 %v974_v1, %v283_v45  ;;  %793 = vst [vmem:[#allocation8 + $0x348] sm:$0xff] %v665_v53  ;;  %794 = vst [vmem:[#allocation8 + $0x350] sm:$0xff] %v666_v54  ;;  %v668_v4 = vadd.f32 %v540_v55, %v410_v49  ;;  %v413_v5 = vmul.f32 %v972_v0, %v156_v50  ;;  %v296_v49 = vld [vmem:[#allocation6 + $0x3d8] sm:$0xff]  ;;  %v169_v50 = vld [vmem:[#allocation3 + $0x3e0] sm:$0xff] }
  0x81   :  { %v543_v6 = vmul.f32 %v974_v1, %v284_v51  ;;  %v414_v7 = vmul.f32 %v972_v0, %v157_v52  ;;  %795 = vst [vmem:[#allocation8 + $0x358] sm:$0xff] %v667_v59  ;;  %v669_v11 = vadd.f32 %v541_v60, %v411_v56  ;;  %v544_v13 = vmul.f32 %v974_v1, %v285_v57  ;;  %v297_v55 = vld [vmem:[#allocation6 + $0x3e0] sm:$0xff]  ;;  %v170_v56 = vld [vmem:[#allocation3 + $0x3e8] sm:$0xff] }
  0x82   :  { %v670_v12 = vadd.f32 %v542_v62, %v412_v61  ;;  %v415_v14 = vmul.f32 %v972_v0, %v158_v58  ;;  %796 = vst [vmem:[#allocation8 + $0x360] sm:$0xff] %v668_v4  ;;  %v545_v18 = vmul.f32 %v974_v1, %v286_v63  ;;  %v416_v19 = vmul.f32 %v972_v0, %v159_v2  ;;  %v298_v61 = vld [vmem:[#allocation6 + $0x3e8] sm:$0xff]  ;;  %v171_v62 = vld [vmem:[#allocation3 + $0x3f0] sm:$0xff] }
  0x83   :  { %v671_v17 = vadd.f32 %v543_v6, %v413_v5  ;;  %v546_v20 = vmul.f32 %v974_v1, %v287_v3  ;;  %797 = vst [vmem:[#allocation8 + $0x368] sm:$0xff] %v669_v11  ;;  %v672_v24 = vadd.f32 %v544_v13, %v414_v7  ;;  %v417_v25 = vmul.f32 %v972_v0, %v160_v8  ;;  %v299_v63 = vld [vmem:[#allocation6 + $0x3f0] sm:$0xff]  ;;  %v172_v6 = vld [vmem:[#allocation3 + $0x3f8] sm:$0xff] }
  0x84   :  { %798 = vst [vmem:[#allocation8 + $0x370] sm:$0xff] %v670_v12  ;;  %v547_v26 = vmul.f32 %v974_v1, %v288_v9  ;;  %v418_v27 = vmul.f32 %v972_v0, %v161_v10  ;;  %v673_v31 = vadd.f32 %v545_v18, %v415_v14  ;;  %v548_v33 = vmul.f32 %v974_v1, %v289_v15  ;;  %v300_v7 = vld [vmem:[#allocation6 + $0x3f8] sm:$0xff] }
  0x85   :  { %799 = vst [vmem:[#allocation8 + $0x378] sm:$0xff] %v671_v17  ;;  %v674_v32 = vadd.f32 %v546_v20, %v416_v19  ;;  %v419_v34 = vmul.f32 %v972_v0, %v162_v16  ;;  %800 = vst [vmem:[#allocation8 + $0x380] sm:$0xff] %v672_v24  ;;  %v549_v38 = vmul.f32 %v974_v1, %v290_v21 }
  0x86   :  { %v675_v37 = vadd.f32 %v547_v26, %v417_v25  ;;  %v420_v39 = vmul.f32 %v972_v0, %v163_v22  ;;  %v550_v40 = vmul.f32 %v974_v1, %v291_v23  ;;  %801 = vst [vmem:[#allocation8 + $0x388] sm:$0xff] %v673_v31  ;;  %v676_v44 = vadd.f32 %v548_v33, %v418_v27 }
  0x87   :  { %802 = vst [vmem:[#allocation8 + $0x390] sm:$0xff] %v674_v32  ;;  %v421_v45 = vmul.f32 %v972_v0, %v164_v28  ;;  %v551_v46 = vmul.f32 %v974_v1, %v292_v29  ;;  %v422_v47 = vmul.f32 %v972_v0, %v165_v30  ;;  %v677_v51 = vadd.f32 %v549_v38, %v419_v34 }
  0x88   :  { %803 = vst [vmem:[#allocation8 + $0x398] sm:$0xff] %v675_v37  ;;  %v678_v52 = vadd.f32 %v550_v40, %v420_v39  ;;  %v552_v53 = vmul.f32 %v974_v1, %v293_v35  ;;  %v423_v54 = vmul.f32 %v972_v0, %v166_v36  ;;  %804 = vst [vmem:[#allocation8 + $0x3a0] sm:$0xff] %v676_v44 }
  0x89   :  { %v679_v57 = vadd.f32 %v551_v46, %v421_v45  ;;  %v553_v58 = vmul.f32 %v974_v1, %v294_v41  ;;  %v424_v59 = vmul.f32 %v972_v0, %v167_v42  ;;  %v554_v60 = vmul.f32 %v974_v1, %v295_v43  ;;  %805 = vst [vmem:[#allocation8 + $0x3a8] sm:$0xff] %v677_v51 }
  0x8a   :  { %806 = vst [vmem:[#allocation8 + $0x3b0] sm:$0xff] %v678_v52  ;;  %v680_v2 = vadd.f32 %v552_v53, %v422_v47  ;;  %v425_v3 = vmul.f32 %v972_v0, %v168_v48  ;;  %v555_v4 = vmul.f32 %v974_v1, %v296_v49  ;;  %v426_v5 = vmul.f32 %v972_v0, %v169_v50 }
  0x8b   :  { %807 = vst [vmem:[#allocation8 + $0x3b8] sm:$0xff] %v679_v57  ;;  %v681_v8 = vadd.f32 %v553_v58, %v423_v54  ;;  %v682_v9 = vadd.f32 %v554_v60, %v424_v59  ;;  %v556_v10 = vmul.f32 %v974_v1, %v297_v55  ;;  %v427_v11 = vmul.f32 %v972_v0, %v170_v56 }
  0x8c   :  { %808 = vst [vmem:[#allocation8 + $0x3c0] sm:$0xff] %v680_v2  ;;  %v683_v12 = vadd.f32 %v555_v4, %v425_v3  ;;  %v557_v13 = vmul.f32 %v974_v1, %v298_v61  ;;  %v428_v14 = vmul.f32 %v972_v0, %v171_v62  ;;  %v558_v15 = vmul.f32 %v974_v1, %v299_v63 }
  0x8d   :  { %809 = vst [vmem:[#allocation8 + $0x3c8] sm:$0xff] %v681_v8  ;;  %810 = vst [vmem:[#allocation8 + $0x3d0] sm:$0xff] %v682_v9  ;;  %v684_v16 = vadd.f32 %v556_v10, %v426_v5  ;;  %v429_v17 = vmul.f32 %v972_v0, %v172_v6  ;;  %v559_v18 = vmul.f32 %v974_v1, %v300_v7 }
  0x8e   :  { %811 = vst [vmem:[#allocation8 + $0x3d8] sm:$0xff] %v683_v12  ;;  %v685_v19 = vadd.f32 %v557_v13, %v427_v11  ;;  %v686_v20 = vadd.f32 %v558_v15, %v428_v14 }
  0x8f   :  { %812 = vst [vmem:[#allocation8 + $0x3e0] sm:$0xff] %v684_v16  ;;  %v687_v21 = vadd.f32 %v559_v18, %v429_v17 }
  0x90   :  { %813 = vst [vmem:[#allocation8 + $0x3e8] sm:$0xff] %v685_v19  ;;  %814 = vst [vmem:[#allocation8 + $0x3f0] sm:$0xff] %v686_v20 }
  0x91   :  { %815 = vst [vmem:[#allocation8 + $0x3f8] sm:$0xff] %v687_v21 }
  0x92   :  { %894 = shalt.err (!%p891_p6)
}
  0x93   :  { %s895_s18 = scalar_lea.hbm %s1250_s3, 16384 }
  0x94   :  { %p896_p7 = scmp.ne.s32.totalorder %s1250_s3, %s895_s18  ;;  %p899_p8 = scmp.lt.u32.totalorder %s895_s18, %s1250_s3 }
  0x96   :  { %p901_p9 = pnand %p899_p8, %p896_p7 }
  0x98   :  { %904 = shalt.err (!%p901_p9)
}
  0x99   :  { %827 = dma.vmem_to_hbm [thread:$0]  %s822_s2, 16384, %s1250_s3, [#allocation5], %s912_s22, %s912_s22, %s913_s23  }
  0x9a   :  { %909 = dma.done.wait [#allocation5], 16384  }
  0x9b   :  { %910 = vsyncadd [#allocation5], 4294950912 }
  0x9c   :  { %831 = vsyncpa [#allocation4], 1 }
  0x9d   :  { %832 = vsyncpa [#allocation7], 1 }
  0x9e   :  { %833 = vsyncpa [#allocation5], 1 }

</bundles_post_ra>
